<compile_context>
chip_gen: v6e
topology: v6e:2x2x1
jax: 0.10.0
libtpu: 0.0.40
codegen_flags: <defaults>
</compile_context>

<pallas_src>
import functools

import jax
import jax.numpy as jnp
from jax.experimental import pallas as pl
from jax.experimental.pallas import tpu as pltpu

RMS_EPS = float(jnp.finfo(jnp.float32).eps)  # matches torch.nn.RMSNorm(eps=None) for f32


def _vmem_limit_bytes():
    # Leave headroom for Mosaic internal scratch / pipeline buffers.
    # v7x: 64 MiB/TC -> 48 MiB limit; v5e/v6e: 128 MiB -> 112 MiB limit.
    try:
        cap = int(pltpu.get_tpu_info().vmem_capacity_bytes)
    except Exception:
        cap = 64 * 1024 * 1024
    return max(32 * 1024 * 1024, cap - 16 * 1024 * 1024)


VMEM_LIMIT = _vmem_limit_bytes()


# -------------------------- Pallas kernels --------------------------

def block_kernel(x_ref, decay_ref, wcat_ref, bias_ref, n1w_ref, n2w_ref,
                 fc1w_ref, fc1b_ref, fc2w_ref, fc2b_ref, fnormw_ref,
                 out_ref, ycat_ref, *, final_norm):
    RB, T, E = x_ref.shape                        # rb batch rows per grid step
    M = decay_ref.shape[0] // T

    x = x_ref[...].reshape(RB * T, E)             # (RB*T, E) f32

    # --- RMSNorm 1 ---
    n1 = x * jax.lax.rsqrt(jnp.mean(x * x, axis=-1, keepdims=True) + RMS_EPS) * n1w_ref[...]
    n1_bf = n1.astype(jnp.bfloat16)

    # --- mixture of EMAs: one stacked (M*T, T) @ (T, E) MXU matmul per batch row ---
    # decay_ref[m*T + i, j] = (1 - a_m) * a_m^(i - j)  for j <= i, else 0; precomputed
    # once per layer in JAX and VMEM-resident across the grid (const index_map).
    decay = decay_ref[...]
    # TODO(synk): for very long T (>~2k) replace the dense (M*T, T) operator with a
    #   T-chunked scan (per-chunk decayed-triangular matmul + carried EMA state) so
    #   FLOPs / VMEM stay linear in T and a second parallel grid axis over T-chunks
    #   can keep both v7x TensorCores busy at small batch.
    for r in range(RB):
        z = jnp.dot(decay, n1_bf[r * T:(r + 1) * T, :],
                    preferred_element_type=jnp.float32)           # (M*T, E)
        for m in range(M):
            ycat_ref[r * T:(r + 1) * T, m * E:(m + 1) * E] = (
                z[m * T:(m + 1) * T, :].astype(jnp.bfloat16))

    # --- fused E*M -> E projection (single wide MXU matmul) + residual ---
    mix = jnp.dot(ycat_ref[...], wcat_ref[...], preferred_element_type=jnp.float32)
    bias = bias_ref[...]                          # (T, E): EMA bias folded through proj + proj bias
    if RB > 1:
        bias = jnp.tile(bias, (RB, 1))
    h = x + mix + bias

    # --- RMSNorm 2 + MLP (SiLU) + residual ---
    n2 = h * jax.lax.rsqrt(jnp.mean(h * h, axis=-1, keepdims=True) + RMS_EPS) * n2w_ref[...]
    u = jnp.dot(n2.astype(jnp.bfloat16), fc1w_ref[...],
                preferred_element_type=jnp.float32) + fc1b_ref[...]
    u = u * jax.nn.sigmoid(u)
    v = jnp.dot(u.astype(jnp.bfloat16), fc2w_ref[...],
                preferred_element_type=jnp.float32) + fc2b_ref[...]
    out = h + v

    if final_norm:
        # final model RMSNorm fused into the last block's epilogue -> head is a pure matmul
        out = (out * jax.lax.rsqrt(jnp.mean(out * out, axis=-1, keepdims=True) + RMS_EPS)
               * fnormw_ref[...])

    out_ref[...] = out.reshape(RB, T, E)


def head_kernel(x_ref, woutT_ref, out_ref):
    out_ref[...] = jnp.dot(x_ref[...].astype(jnp.bfloat16), woutT_ref[...],
                           preferred_element_type=jnp.float32).astype(out_ref.dtype)


# -------------------------- wrappers --------------------------

def _const_spec(shape):
    n = len(shape)
    return pl.BlockSpec(shape, lambda *_: (0,) * n)


def _estimate_block_vmem(rb, T, E, M, D):
    act = 2 * 2 * rb * T * E * 4                      # x in + out, double-buffered
    decay = 2 * M * T * T * 2                         # stacked EMA operator (bf16)
    weights = 2 * (M * E * E + 2 * E * D) * 2         # bf16 weights, double-buffered
    ycat = rb * T * M * E * 2                         # staging scratch
    temps = rb * T * (8 * E + 2 * D) * 4 + M * T * E * 4
    small = 32 * (E + D) * 4 + 2 * T * E * 4
    return act + decay + weights + ycat + temps + small


def _pick_rb(B, T, E, M, D):
    budget = VMEM_LIMIT // 2
    for rb in (4, 2, 1):
        if B % rb == 0 and _estimate_block_vmem(rb, T, E, M, D) <= budget:
            return rb
    return 1


def run_block(x, lp, final_normw, final_norm):
    B, T, E = x.shape
    M = lp["wcat"].shape[0] // E
    D = lp["fc1w"].shape[1]
    rb = _pick_rb(B, T, E, M, D)
    steps = B // rb

    flops = 2 * B * T * (M * T * E + M * E * E + 2 * E * D)
    transcendentals = B * T * (D + 4)
    bytes_accessed = (2 * B * T * E * 4                      # activations in/out (f32)
                      + M * T * T * 2                        # decay operator (bf16, once)
                      + (M * E * E + 2 * E * D) * 2          # bf16 weights
                      + T * E * 4 + (4 * E + D) * 4)         # bias tables / norm weights

    kern = functools.partial(block_kernel, final_norm=final_norm)
    return pl.pallas_call(
        kern,
        out_shape=jax.ShapeDtypeStruct((B, T, E), jnp.float32),
        grid=(steps,),
        in_specs=[
            pl.BlockSpec((rb, T, E), lambda b: (b, 0, 0)),
            _const_spec((M * T, T)),                         # stacked decay operator (bf16)
            _const_spec((M * E, E)),                         # fused proj weight (bf16)
            _const_spec((T, E)),                             # EMA bias folded through proj (f32)
            _const_spec((1, E)), _const_spec((1, E)),        # norm1 / norm2 weights
            _const_spec((E, D)), _const_spec((1, D)),        # fc1
            _const_spec((D, E)), _const_spec((1, E)),        # fc2
            _const_spec((1, E)),                             # final model norm weight
        ],
        out_specs=pl.BlockSpec((rb, T, E), lambda b: (b, 0, 0)),
        scratch_shapes=[pltpu.VMEM((rb * T, M * E), jnp.bfloat16)],  # y_cat staging buffer
        compiler_params=pltpu.CompilerParams(
            dimension_semantics=("parallel",),               # batch across TCs (v7x megacore)
            vmem_limit_bytes=VMEM_LIMIT,
        ),
        cost_estimate=pl.CostEstimate(flops=int(flops),
                                      transcendentals=int(transcendentals),
                                      bytes_accessed=int(bytes_accessed)),
    )(x, lp["decay"], lp["wcat"], lp["bias_all"], lp["n1w"], lp["n2w"],
      lp["fc1w"], lp["fc1b"], lp["fc2w"], lp["fc2b"], final_normw)


def run_head(x2d, woutT):
    N, E = x2d.shape
    V = woutT.shape[1]
    # Large row tiles (fewer vocab-weight re-reads); pl.cdiv grids handle irregular
    # N / V via Pallas edge-block padding/masking (no full-extent fallback).
    tm = N if N <= 1024 else 1024
    tn = V if V <= 1024 else 512
    grid = (pl.cdiv(N, tm), pl.cdiv(V, tn))

    flops = 2 * N * E * V
    bytes_accessed = N * E * 4 + grid[0] * E * V * 2 + N * V * 2
    return pl.pallas_call(
        head_kernel,
        out_shape=jax.ShapeDtypeStruct((N, V), jnp.bfloat16),  # bf16 logits: head is HBM-bound
        grid=grid,
        in_specs=[
            pl.BlockSpec((tm, E), lambda i, j: (i, 0)),
            pl.BlockSpec((E, tn), lambda i, j: (0, j)),
        ],
        out_specs=pl.BlockSpec((tm, tn), lambda i, j: (i, j)),
        compiler_params=pltpu.CompilerParams(
            dimension_semantics=("parallel", "parallel"),
            vmem_limit_bytes=VMEM_LIMIT,
        ),
        cost_estimate=pl.CostEstimate(flops=int(flops), transcendentals=0,
                                      bytes_accessed=int(bytes_accessed)),
    )(x2d, woutT)


def forward(tokens, kparams):
    x = jnp.take(kparams["emb"], tokens, axis=0)   # (B, T, E) embedding gather (glue)
    n_layer = len(kparams["layers"])
    for i, lp in enumerate(kparams["layers"]):
        x = run_block(x, lp, kparams["normw"], final_norm=(i == n_layer - 1))
    B, T, E = x.shape
    logits = run_head(x.reshape(B * T, E), kparams["woutT"])
    return logits.reshape(B, T, -1)


# -------------------------- parameter init (deterministic) --------------------------

def init_raw_params(key, V, E, M, D, n_layer):
    std = 0.02
    keys = jax.random.split(key, 2 + 5 * n_layer)
    raw = {
        "emb": std * jax.random.normal(keys[0], (V, E), jnp.float32),
        "outW": std * jax.random.normal(keys[1], (V, E), jnp.float32),
        "normw": jnp.ones((E,), jnp.float32),
        "layers": [],
    }
    init_alpha = 0.9
    inv_sig = float(jnp.log(jnp.float32(init_alpha) / (1.0 - jnp.float32(init_alpha))))
    for i in range(n_layer):
        k = keys[2 + 5 * i: 2 + 5 * (i + 1)]
        raw["layers"].append({
            # small perturbations so every EMA stream (and the bias path) is exercised
            "alpha_logits": inv_sig + 0.25 * jax.random.normal(k[0], (M,), jnp.float32),
            "ema_bias": 0.05 * jax.random.normal(k[1], (M,), jnp.float32),
            "projW": std * jax.random.normal(k[2], (E, E * M), jnp.float32),
            "projb": jnp.zeros((E,), jnp.float32),
            "n1w": jnp.ones((E,), jnp.float32),
            "n2w": jnp.ones((E,), jnp.float32),
            "fc1W": std * jax.random.normal(k[3], (D, E), jnp.float32),
            "fc1b": jnp.zeros((D,), jnp.float32),
            "fc2W": std * jax.random.normal(k[4], (E, D), jnp.float32),
            "fc2b": jnp.zeros((E,), jnp.float32),
        })
    return raw


def derive_kernel_params(raw, T):
    layers = []
    for lp in raw["layers"]:
        E = lp["projW"].shape[0]
        M = lp["alpha_logits"].shape[0]
        a = jax.nn.sigmoid(lp["alpha_logits"])                     # (M,)
        s = 1.0 - a
        log_a = jnp.log(a)

        # Stacked decayed-triangular EMA operator, precomputed ONCE per layer:
        #   decay[m*T + i, j] = (1 - a_m) * a_m^(i - j)  for j <= i, else 0.
        t = jnp.arange(T, dtype=jnp.float32)
        diff = t[:, None] - t[None, :]                             # (T, T)
        causal = diff >= 0.0
        diff_c = jnp.maximum(diff, 0.0)                            # exponent <= 0, no overflow
        dec = jnp.where(causal[None], jnp.exp(log_a[:, None, None] * diff_c[None]), 0.0)
        dec = dec * s[:, None, None]                               # fold (1 - a_m) into operator
        # TODO(synk): keep the operator in f32 (and cast only the activations) if bf16
        #   accumulation error at production T proves too large.
        decay = dec.reshape(M * T, T).astype(jnp.bfloat16)

        # EMA bias term folded through the projection into an exact f32 (T, E) tensor.
        a_t1 = jnp.exp(log_a[:, None] * (t[None, :] + 1.0))        # (M, T) = a^(t+1)
        denom = jnp.maximum(s, 1e-8)
        bias_seq = lp["ema_bias"][:, None] * (1.0 - a_t1) / denom[:, None]   # (M, T)
        projW_r = lp["projW"].reshape(E, E, M)                     # [o, e, m]
        wsum = jnp.transpose(projW_r.sum(axis=1), (1, 0))          # (M, E_out)
        bias_all = bias_seq.T @ wsum + lp["projb"][None, :]        # (T, E)

        # Fused projection weight: y_cat column index is m*E + e, torch column is e*M + m.
        # W_cat[m*E + e, o] = projW[o, e*M + m]
        wcat = jnp.transpose(projW_r, (2, 1, 0)).reshape(M * E, E)

        layers.append({
            "decay": decay,
            "wcat": wcat.astype(jnp.bfloat16),
            "bias_all": bias_all.astype(jnp.float32),
            "n1w": lp["n1w"].reshape(1, E),
            "n2w": lp["n2w"].reshape(1, E),
            "fc1w": lp["fc1W"].T.astype(jnp.bfloat16),
            "fc1b": lp["fc1b"].reshape(1, -1),
            "fc2w": lp["fc2W"].T.astype(jnp.bfloat16),
            "fc2b": lp["fc2b"].reshape(1, E),
        })
    return {
        "emb": raw["emb"],
        "layers": layers,
        "normw": raw["normw"].reshape(1, -1),
        "woutT": raw["outW"].T.astype(jnp.bfloat16),
    }


# -------------------------- pure-JAX reference (torch semantics, f32) --------------------------

def ref_forward(tokens, raw):
    def rms(v, w):
        return v * jax.lax.rsqrt(jnp.mean(v * v, -1, keepdims=True) + RMS_EPS) * w

    x = jnp.take(raw["emb"], tokens, axis=0)
    for lp in raw["layers"]:
        B, T, E = x.shape
        n1 = rms(x, lp["n1w"])
        a = jax.nn.sigmoid(lp["alpha_logits"]); s = 1.0 - a
        M = a.shape[0]
        xt = jnp.transpose(n1, (0, 2, 1))                      # (B, E, T)
        t = jnp.arange(T, dtype=jnp.float32)[None, :]
        loga = jnp.log(a)[:, None]
        a_neg = jnp.exp(-loga * t); a_pos = jnp.exp(loga * t)  # (M, T)
        weighted = xt[:, None] * s.reshape(1, M, 1, 1) * a_neg.reshape(1, M, 1, T)
        z = jnp.cumsum(weighted, axis=-1)
        y = z * a_pos.reshape(1, M, 1, T)
        a_t1 = a_pos * a[:, None]
        denom = jnp.maximum(s, 1e-8)
        bias_seq = lp["ema_bias"][:, None] * (1.0 - a_t1) / denom[:, None]
        y = y + bias_seq.reshape(1, M, 1, T)
        y = jnp.transpose(y, (0, 3, 2, 1)).reshape(B, T, E * M)
        yproj = y @ lp["projW"].T + lp["projb"]
        h = x + yproj
        n2 = rms(h, lp["n2w"])
        u = n2 @ lp["fc1W"].T + lp["fc1b"]
        u = u * jax.nn.sigmoid(u)
        x = h + (u @ lp["fc2W"].T + lp["fc2b"])
    x = rms(x, raw["normw"])
    return x @ raw["outW"].T


# -------------------------- main --------------------------

if __name__ == "__main__":
    # small config consistent with the module: (B, T) token ids -> (B, T, V) logits
    B, T = 2, 16
    V, E, M, D, N_LAYER = 256, 128, 4, 256, 2

    key = jax.random.PRNGKey(0)
    key_p, key_tok = jax.random.split(key)
    raw = init_raw_params(key_p, V, E, M, D, N_LAYER)
    kparams = derive_kernel_params(raw, T)

    tokens = jax.random.randint(key_tok, (B, T), 0, V, dtype=jnp.int32)

    logits = forward(tokens, kparams)
    logits = jax.block_until_ready(logits)

    ref = ref_forward(tokens, raw)
    err = float(jnp.max(jnp.abs(logits.astype(jnp.float32) - ref)))
    scale = float(jnp.max(jnp.abs(ref)))
    assert logits.shape == (B, T, V), logits.shape
    tol = 2e-3 + 5e-2 * scale          # bf16 weights / operands / logits vs f32 reference
    assert err <= tol, f"max abs error {err} vs reference (scale {scale}, tol {tol})"
    print("KERNEL_OK")
</pallas_src>

<mosaic_0001>
module attributes {stable_mosaic.version = 11 : i64} {
  func.func @block_kernel(%arg0: i32, %arg1: memref<2x16x128xf32, #tpu.memory_space<vmem>>, %arg2: memref<64x16xbf16, #tpu.memory_space<vmem>>, %arg3: memref<512x128xbf16, #tpu.memory_space<vmem>>, %arg4: memref<16x128xf32, #tpu.memory_space<vmem>>, %arg5: memref<1x128xf32, #tpu.memory_space<vmem>>, %arg6: memref<1x128xf32, #tpu.memory_space<vmem>>, %arg7: memref<128x256xbf16, #tpu.memory_space<vmem>>, %arg8: memref<1x256xf32, #tpu.memory_space<vmem>>, %arg9: memref<256x128xbf16, #tpu.memory_space<vmem>>, %arg10: memref<1x128xf32, #tpu.memory_space<vmem>>, %arg11: memref<1x128xf32, #tpu.memory_space<vmem>>, %arg12: memref<2x16x128xf32, #tpu.memory_space<vmem>>, %arg13: memref<32x512xbf16, #tpu.memory_space<vmem>>) attributes {dimension_semantics = [#tpu.dimension_semantics<parallel>], iteration_bounds = array<i64: 1>, scalar_prefetch = 0 : i64, scratch_operands = 1 : i64, tpu.core_type = #tpu.core_type<tc>, window_params = [{transform_indices = @transform_0, window_bounds = array<i64: 2, 16, 128>}, {pipeline_mode = #tpu.pipeline_mode<synchronous>, transform_indices = @transform_1, window_bounds = array<i64: 64, 16>}, {pipeline_mode = #tpu.pipeline_mode<synchronous>, transform_indices = @transform_2, window_bounds = array<i64: 512, 128>}, {pipeline_mode = #tpu.pipeline_mode<synchronous>, transform_indices = @transform_3, window_bounds = array<i64: 16, 128>}, {pipeline_mode = #tpu.pipeline_mode<synchronous>, transform_indices = @transform_4, window_bounds = array<i64: 1, 128>}, {pipeline_mode = #tpu.pipeline_mode<synchronous>, transform_indices = @transform_5, window_bounds = array<i64: 1, 128>}, {pipeline_mode = #tpu.pipeline_mode<synchronous>, transform_indices = @transform_6, window_bounds = array<i64: 128, 256>}, {pipeline_mode = #tpu.pipeline_mode<synchronous>, transform_indices = @transform_7, window_bounds = array<i64: 1, 256>}, {pipeline_mode = #tpu.pipeline_mode<synchronous>, transform_indices = @transform_8, window_bounds = array<i64: 256, 128>}, {pipeline_mode = #tpu.pipeline_mode<synchronous>, transform_indices = @transform_9, window_bounds = array<i64: 1, 128>}, {pipeline_mode = #tpu.pipeline_mode<synchronous>, transform_indices = @transform_10, window_bounds = array<i64: 1, 128>}, {transform_indices = @transform_11, window_bounds = array<i64: 2, 16, 128>}]} {
    %c0 = arith.constant 0 : index
    %c0_0 = arith.constant 0 : index
    %c0_1 = arith.constant 0 : index
    %0 = vector.load %arg1[%c0, %c0_0, %c0_1] : memref<2x16x128xf32, #tpu.memory_space<vmem>>, vector<2x16x128xf32>
    %1 = vector.shape_cast %0 : vector<2x16x128xf32> to vector<32x128xf32>
    %2 = arith.mulf %1, %1 : vector<32x128xf32>
    %cst = arith.constant dense<0.000000e+00> : vector<32xf32>
    %3 = vector.multi_reduction <add>, %2, %cst [1] : vector<32x128xf32> to vector<32xf32>
    %4 = vector.shape_cast %3 : vector<32xf32> to vector<32x1xf32>
    %cst_2 = arith.constant 1.280000e+02 : f32
    %5 = vector.broadcast %cst_2 : f32 to vector<32x1xf32>
    %6 = arith.divf %4, %5 : vector<32x1xf32>
    %cst_3 = arith.constant 1.1920929E-7 : f32
    %7 = vector.broadcast %cst_3 : f32 to vector<32x1xf32>
    %8 = arith.addf %6, %7 : vector<32x1xf32>
    %9 = math.rsqrt %8 : vector<32x1xf32>
    %10 = vector.broadcast %9 : vector<32x1xf32> to vector<32x128xf32>
    %11 = arith.mulf %1, %10 : vector<32x128xf32>
    %c0_4 = arith.constant 0 : index
    %c0_5 = arith.constant 0 : index
    %12 = vector.load %arg5[%c0_4, %c0_5] : memref<1x128xf32, #tpu.memory_space<vmem>>, vector<1x128xf32>
    %13 = vector.broadcast %12 : vector<1x128xf32> to vector<32x128xf32>
    %14 = arith.mulf %11, %13 : vector<32x128xf32>
    %15 = arith.truncf %14 : vector<32x128xf32> to vector<32x128xbf16>
    %c0_6 = arith.constant 0 : index
    %c0_7 = arith.constant 0 : index
    %16 = vector.load %arg2[%c0_6, %c0_7] : memref<64x16xbf16, #tpu.memory_space<vmem>>, vector<64x16xbf16>
    %17 = vector.extract_strided_slice %15 {offsets = [0, 0], sizes = [16, 128], strides = [1, 1]} : vector<32x128xbf16> to vector<16x128xbf16>
    %cst_8 = arith.constant dense<0.000000e+00> : vector<64x128xf32>
    %18 = tpu.matmul %16, %17, %cst_8 {dimension_numbers = #tpu.dot_dimension_numbers<[1], [0], [0], [1], [0, 0, 1, 1], [], []>} : vector<64x16xbf16>, vector<16x128xbf16>, vector<64x128xf32> -> vector<64x128xf32>
    %19 = vector.extract_strided_slice %18 {offsets = [0, 0], sizes = [16, 128], strides = [1, 1]} : vector<64x128xf32> to vector<16x128xf32>
    %20 = arith.truncf %19 : vector<16x128xf32> to vector<16x128xbf16>
    %c0_9 = arith.constant 0 : index
    %c0_10 = arith.constant 0 : index
    %21 = vector.load %arg13[%c0_9, %c0_10] : memref<32x512xbf16, #tpu.memory_space<vmem>>, vector<16x128xbf16>
    tpu.vector_store %arg13[%c0_9, %c0_10], %20 {strides = array<i32>} : memref<32x512xbf16, #tpu.memory_space<vmem>>, vector<16x128xbf16>,
    %22 = vector.extract_strided_slice %18 {offsets = [16, 0], sizes = [16, 128], strides = [1, 1]} : vector<64x128xf32> to vector<16x128xf32>
    %23 = arith.truncf %22 : vector<16x128xf32> to vector<16x128xbf16>
    %c0_11 = arith.constant 0 : index
    %c128 = arith.constant 128 : index
    %24 = vector.load %arg13[%c0_11, %c128] : memref<32x512xbf16, #tpu.memory_space<vmem>>, vector<16x128xbf16>
    tpu.vector_store %arg13[%c0_11, %c128], %23 {strides = array<i32>} : memref<32x512xbf16, #tpu.memory_space<vmem>>, vector<16x128xbf16>,
    %25 = vector.extract_strided_slice %18 {offsets = [32, 0], sizes = [16, 128], strides = [1, 1]} : vector<64x128xf32> to vector<16x128xf32>
    %26 = arith.truncf %25 : vector<16x128xf32> to vector<16x128xbf16>
    %c0_12 = arith.constant 0 : index
    %c256 = arith.constant 256 : index
    %27 = vector.load %arg13[%c0_12, %c256] : memref<32x512xbf16, #tpu.memory_space<vmem>>, vector<16x128xbf16>
    tpu.vector_store %arg13[%c0_12, %c256], %26 {strides = array<i32>} : memref<32x512xbf16, #tpu.memory_space<vmem>>, vector<16x128xbf16>,
    %28 = vector.extract_strided_slice %18 {offsets = [48, 0], sizes = [16, 128], strides = [1, 1]} : vector<64x128xf32> to vector<16x128xf32>
    %29 = arith.truncf %28 : vector<16x128xf32> to vector<16x128xbf16>
    %c0_13 = arith.constant 0 : index
    %c384 = arith.constant 384 : index
    %30 = vector.load %arg13[%c0_13, %c384] : memref<32x512xbf16, #tpu.memory_space<vmem>>, vector<16x128xbf16>
    tpu.vector_store %arg13[%c0_13, %c384], %29 {strides = array<i32>} : memref<32x512xbf16, #tpu.memory_space<vmem>>, vector<16x128xbf16>,
    %31 = vector.extract_strided_slice %15 {offsets = [16, 0], sizes = [16, 128], strides = [1, 1]} : vector<32x128xbf16> to vector<16x128xbf16>
    %cst_14 = arith.constant dense<0.000000e+00> : vector<64x128xf32>
    %32 = tpu.matmul %16, %31, %cst_14 {dimension_numbers = #tpu.dot_dimension_numbers<[1], [0], [0], [1], [0, 0, 1, 1], [], []>} : vector<64x16xbf16>, vector<16x128xbf16>, vector<64x128xf32> -> vector<64x128xf32>
    %33 = vector.extract_strided_slice %32 {offsets = [0, 0], sizes = [16, 128], strides = [1, 1]} : vector<64x128xf32> to vector<16x128xf32>
    %34 = arith.truncf %33 : vector<16x128xf32> to vector<16x128xbf16>
    %c16 = arith.constant 16 : index
    %c0_15 = arith.constant 0 : index
    %35 = vector.load %arg13[%c16, %c0_15] : memref<32x512xbf16, #tpu.memory_space<vmem>>, vector<16x128xbf16>
    tpu.vector_store %arg13[%c16, %c0_15], %34 {strides = array<i32>} : memref<32x512xbf16, #tpu.memory_space<vmem>>, vector<16x128xbf16>,
    %36 = vector.extract_strided_slice %32 {offsets = [16, 0], sizes = [16, 128], strides = [1, 1]} : vector<64x128xf32> to vector<16x128xf32>
    %37 = arith.truncf %36 : vector<16x128xf32> to vector<16x128xbf16>
    %c16_16 = arith.constant 16 : index
    %c128_17 = arith.constant 128 : index
    %38 = vector.load %arg13[%c16_16, %c128_17] : memref<32x512xbf16, #tpu.memory_space<vmem>>, vector<16x128xbf16>
    tpu.vector_store %arg13[%c16_16, %c128_17], %37 {strides = array<i32>} : memref<32x512xbf16, #tpu.memory_space<vmem>>, vector<16x128xbf16>,
    %39 = vector.extract_strided_slice %32 {offsets = [32, 0], sizes = [16, 128], strides = [1, 1]} : vector<64x128xf32> to vector<16x128xf32>
    %40 = arith.truncf %39 : vector<16x128xf32> to vector<16x128xbf16>
    %c16_18 = arith.constant 16 : index
    %c256_19 = arith.constant 256 : index
    %41 = vector.load %arg13[%c16_18, %c256_19] : memref<32x512xbf16, #tpu.memory_space<vmem>>, vector<16x128xbf16>
    tpu.vector_store %arg13[%c16_18, %c256_19], %40 {strides = array<i32>} : memref<32x512xbf16, #tpu.memory_space<vmem>>, vector<16x128xbf16>,
    %42 = vector.extract_strided_slice %32 {offsets = [48, 0], sizes = [16, 128], strides = [1, 1]} : vector<64x128xf32> to vector<16x128xf32>
    %43 = arith.truncf %42 : vector<16x128xf32> to vector<16x128xbf16>
    %c16_20 = arith.constant 16 : index
    %c384_21 = arith.constant 384 : index
    %44 = vector.load %arg13[%c16_20, %c384_21] : memref<32x512xbf16, #tpu.memory_space<vmem>>, vector<16x128xbf16>
    tpu.vector_store %arg13[%c16_20, %c384_21], %43 {strides = array<i32>} : memref<32x512xbf16, #tpu.memory_space<vmem>>, vector<16x128xbf16>,
    %c0_22 = arith.constant 0 : index
    %c0_23 = arith.constant 0 : index
    %45 = vector.load %arg13[%c0_22, %c0_23] : memref<32x512xbf16, #tpu.memory_space<vmem>>, vector<32x512xbf16>
    %c0_24 = arith.constant 0 : index
    %c0_25 = arith.constant 0 : index
    %46 = vector.load %arg3[%c0_24, %c0_25] : memref<512x128xbf16, #tpu.memory_space<vmem>>, vector<512x128xbf16>
    %cst_26 = arith.constant dense<0.000000e+00> : vector<32x128xf32>
    %47 = tpu.matmul %45, %46, %cst_26 {dimension_numbers = #tpu.dot_dimension_numbers<[1], [0], [0], [1], [0, 0, 1, 1], [], []>} : vector<32x512xbf16>, vector<512x128xbf16>, vector<32x128xf32> -> vector<32x128xf32>
    %c0_27 = arith.constant 0 : index
    %c0_28 = arith.constant 0 : index
    %48 = vector.load %arg4[%c0_27, %c0_28] : memref<16x128xf32, #tpu.memory_space<vmem>>, vector<16x128xf32>
    %49 = tpu.concatenate %48, %48 in 0 : vector<16x128xf32>, vector<16x128xf32> -> vector<32x128xf32>
    %50 = arith.addf %1, %47 : vector<32x128xf32>
    %51 = arith.addf %50, %49 : vector<32x128xf32>
    %52 = arith.mulf %51, %51 : vector<32x128xf32>
    %cst_29 = arith.constant dense<0.000000e+00> : vector<32xf32>
    %53 = vector.multi_reduction <add>, %52, %cst_29 [1] : vector<32x128xf32> to vector<32xf32>
    %54 = vector.shape_cast %53 : vector<32xf32> to vector<32x1xf32>
    %cst_30 = arith.constant 1.280000e+02 : f32
    %55 = vector.broadcast %cst_30 : f32 to vector<32x1xf32>
    %56 = arith.divf %54, %55 : vector<32x1xf32>
    %cst_31 = arith.constant 1.1920929E-7 : f32
    %57 = vector.broadcast %cst_31 : f32 to vector<32x1xf32>
    %58 = arith.addf %56, %57 : vector<32x1xf32>
    %59 = math.rsqrt %58 : vector<32x1xf32>
    %60 = vector.broadcast %59 : vector<32x1xf32> to vector<32x128xf32>
    %61 = arith.mulf %51, %60 : vector<32x128xf32>
    %c0_32 = arith.constant 0 : index
    %c0_33 = arith.constant 0 : index
    %62 = vector.load %arg6[%c0_32, %c0_33] : memref<1x128xf32, #tpu.memory_space<vmem>>, vector<1x128xf32>
    %63 = vector.broadcast %62 : vector<1x128xf32> to vector<32x128xf32>
    %64 = arith.mulf %61, %63 : vector<32x128xf32>
    %65 = arith.truncf %64 : vector<32x128xf32> to vector<32x128xbf16>
    %c0_34 = arith.constant 0 : index
    %c0_35 = arith.constant 0 : index
    %66 = vector.load %arg7[%c0_34, %c0_35] : memref<128x256xbf16, #tpu.memory_space<vmem>>, vector<128x256xbf16>
    %cst_36 = arith.constant dense<0.000000e+00> : vector<32x256xf32>
    %67 = tpu.matmul %65, %66, %cst_36 {dimension_numbers = #tpu.dot_dimension_numbers<[1], [0], [0], [1], [0, 0, 1, 1], [], []>} : vector<32x128xbf16>, vector<128x256xbf16>, vector<32x256xf32> -> vector<32x256xf32>
    %c0_37 = arith.constant 0 : index
    %c0_38 = arith.constant 0 : index
    %68 = vector.load %arg8[%c0_37, %c0_38] : memref<1x256xf32, #tpu.memory_space<vmem>>, vector<1x256xf32>
    %69 = vector.broadcast %68 : vector<1x256xf32> to vector<32x256xf32>
    %70 = arith.addf %67, %69 : vector<32x256xf32>
    %71 = arith.negf %70 : vector<32x256xf32>
    %72 = math.exp %71 : vector<32x256xf32>
    %cst_39 = arith.constant 1.000000e+00 : f32
    %73 = vector.broadcast %cst_39 : f32 to vector<32x256xf32>
    %74 = arith.addf %73, %72 : vector<32x256xf32>
    %75 = arith.divf %73, %74 : vector<32x256xf32>
    %76 = arith.mulf %70, %75 : vector<32x256xf32>
    %77 = arith.truncf %76 : vector<32x256xf32> to vector<32x256xbf16>
    %c0_40 = arith.constant 0 : index
    %c0_41 = arith.constant 0 : index
    %78 = vector.load %arg9[%c0_40, %c0_41] : memref<256x128xbf16, #tpu.memory_space<vmem>>, vector<256x128xbf16>
    %cst_42 = arith.constant dense<0.000000e+00> : vector<32x128xf32>
    %79 = tpu.matmul %77, %78, %cst_42 {dimension_numbers = #tpu.dot_dimension_numbers<[1], [0], [0], [1], [0, 0, 1, 1], [], []>} : vector<32x256xbf16>, vector<256x128xbf16>, vector<32x128xf32> -> vector<32x128xf32>
    %c0_43 = arith.constant 0 : index
    %c0_44 = arith.constant 0 : index
    %80 = vector.load %arg10[%c0_43, %c0_44] : memref<1x128xf32, #tpu.memory_space<vmem>>, vector<1x128xf32>
    %81 = vector.broadcast %80 : vector<1x128xf32> to vector<32x128xf32>
    %82 = arith.addf %79, %81 : vector<32x128xf32>
    %83 = arith.addf %51, %82 : vector<32x128xf32>
    %84 = vector.shape_cast %83 : vector<32x128xf32> to vector<2x16x128xf32>
    %c0_45 = arith.constant 0 : index
    %c0_46 = arith.constant 0 : index
    %c0_47 = arith.constant 0 : index
    %85 = vector.load %arg12[%c0_45, %c0_46, %c0_47] : memref<2x16x128xf32, #tpu.memory_space<vmem>>, vector<2x16x128xf32>
    tpu.vector_store %arg12[%c0_45, %c0_46, %c0_47], %84 {strides = array<i32>} : memref<2x16x128xf32, #tpu.memory_space<vmem>>, vector<2x16x128xf32>,
    return
  }
  func.func @transform_0(%arg0: i32) -> (i32, i32, i32) {
    %c0_i32 = arith.constant 0 : i32
    %c0_i32_0 = arith.constant 0 : i32
    %c0_i32_1 = arith.constant 0 : i32
    return %arg0, %c0_i32, %c0_i32_0 : i32, i32, i32
  }
  func.func @transform_1(%arg0: i32) -> (i32, i32) {
    %c0_i32 = arith.constant 0 : i32
    %c0_i32_0 = arith.constant 0 : i32
    %c0_i32_1 = arith.constant 0 : i32
    return %c0_i32, %c0_i32_0 : i32, i32
  }
  func.func @transform_2(%arg0: i32) -> (i32, i32) {
    %c0_i32 = arith.constant 0 : i32
    %c0_i32_0 = arith.constant 0 : i32
    %c0_i32_1 = arith.constant 0 : i32
    return %c0_i32, %c0_i32_0 : i32, i32
  }
  func.func @transform_3(%arg0: i32) -> (i32, i32) {
    %c0_i32 = arith.constant 0 : i32
    %c0_i32_0 = arith.constant 0 : i32
    %c0_i32_1 = arith.constant 0 : i32
    return %c0_i32, %c0_i32_0 : i32, i32
  }
  func.func @transform_4(%arg0: i32) -> (i32, i32) {
    %c0_i32 = arith.constant 0 : i32
    %c0_i32_0 = arith.constant 0 : i32
    %c0_i32_1 = arith.constant 0 : i32
    return %c0_i32, %c0_i32_0 : i32, i32
  }
  func.func @transform_5(%arg0: i32) -> (i32, i32) {
    %c0_i32 = arith.constant 0 : i32
    %c0_i32_0 = arith.constant 0 : i32
    %c0_i32_1 = arith.constant 0 : i32
    return %c0_i32, %c0_i32_0 : i32, i32
  }
  func.func @transform_6(%arg0: i32) -> (i32, i32) {
    %c0_i32 = arith.constant 0 : i32
    %c0_i32_0 = arith.constant 0 : i32
    %c0_i32_1 = arith.constant 0 : i32
    return %c0_i32, %c0_i32_0 : i32, i32
  }
  func.func @transform_7(%arg0: i32) -> (i32, i32) {
    %c0_i32 = arith.constant 0 : i32
    %c0_i32_0 = arith.constant 0 : i32
    %c0_i32_1 = arith.constant 0 : i32
    return %c0_i32, %c0_i32_0 : i32, i32
  }
  func.func @transform_8(%arg0: i32) -> (i32, i32) {
    %c0_i32 = arith.constant 0 : i32
    %c0_i32_0 = arith.constant 0 : i32
    %c0_i32_1 = arith.constant 0 : i32
    return %c0_i32, %c0_i32_0 : i32, i32
  }
  func.func @transform_9(%arg0: i32) -> (i32, i32) {
    %c0_i32 = arith.constant 0 : i32
    %c0_i32_0 = arith.constant 0 : i32
    %c0_i32_1 = arith.constant 0 : i32
    return %c0_i32, %c0_i32_0 : i32, i32
  }
  func.func @transform_10(%arg0: i32) -> (i32, i32) {
    %c0_i32 = arith.constant 0 : i32
    %c0_i32_0 = arith.constant 0 : i32
    %c0_i32_1 = arith.constant 0 : i32
    return %c0_i32, %c0_i32_0 : i32, i32
  }
  func.func @transform_11(%arg0: i32) -> (i32, i32, i32) {
    %c0_i32 = arith.constant 0 : i32
    %c0_i32_0 = arith.constant 0 : i32
    %c0_i32_1 = arith.constant 0 : i32
    return %arg0, %c0_i32, %c0_i32_0 : i32, i32, i32
  }
}

</mosaic_0001>

<bundles_post_ra>
// kernel: tpu_custom_call.1
= control target key start
LH: loop header
LB: loop body
LE: loop exit
PB: predicated region body
PF: predicated region fallthrough
CT: control target
= control target key end

     0   :  { %16 = vsyncpa [#allocation4], 0  ;;  %s2001_s0 = inlined_call_operand.vmem [shape: f32[2,16,128], index: 0, kind: input, shape index: {}]   ;;  %s2002_s1 = inlined_call_operand.vmem [shape: bf16[64,16], index: 1, kind: input, shape index: {}]   ;;  %s2003_s2 = inlined_call_operand.hbm [shape: bf16[512,128], index: 2, kind: input, shape index: {}]   ;;  %s2004_s3 = inlined_call_operand.hbm [shape: f32[16,128], index: 3, kind: input, shape index: {}]   ;;  %s2005_s4 = inlined_call_operand.vmem [shape: f32[1,128], index: 4, kind: input, shape index: {}]   ;;  %s2006_s5 = inlined_call_operand.vmem [shape: f32[1,128], index: 5, kind: input, shape index: {}]   ;;  %s2007_s6 = inlined_call_operand.hbm [shape: bf16[128,256], index: 6, kind: input, shape index: {}]   ;;  %s2008_s7 = inlined_call_operand.vmem [shape: f32[1,256], index: 7, kind: input, shape index: {}]   ;;  %s2009_s8 = inlined_call_operand.hbm [shape: bf16[256,128], index: 8, kind: input, shape index: {}]   ;;  %s2010_s9 = inlined_call_operand.vmem [shape: f32[1,128], index: 9, kind: input, shape index: {}]   ;;  %s2011_s10 = inlined_call_operand.vmem [shape: f32[1,128], index: 10, kind: input, shape index: {}]   ;;  %s2012_s11 = inlined_call_operand.hbm [shape: f32[2,16,128], index: 11, kind: output, shape index: {}]  }
   0x1   :  { %17 = vsyncpa [#allocation7], 0 }
   0x2   :  { %18 = vsyncpa [#allocation10], 0 }
   0x3   :  { %19 = vsyncpa [#allocation5], 0  ;;  %s1815_s17 = smov [#allocation6]  }
   0x4   :  { %s41_s18 = sshll.u32 %s1815_s17, 4  ;;  %s42_s18 = int_to_ptr.vmem [resolvable:$true] %s41_s18 }
   0x5   :  { %s1715_s19 = scalar_lea.vmem %s42_s18, 256  ;;  %p1720_p1 = scmp.lt.s32.totalorder %s42_s18, %s42_s18 }
   0x6   :  { %p1716_p0 = scmp.ne.s32.totalorder %s42_s18, %s1715_s19  ;;  %p1721_p2 = scmp.lt.s32.totalorder %s1715_s19, %s1715_s19 }
   0x8   :  { %p1722_p3 = por %p1721_p2, %p1720_p1 }
   0xa   :  { %p1723_p4 = pnand %p1722_p3, %p1716_p0 }
   0xc   :  { %1726 = shalt.err (!%p1723_p4)
}
   0xd   :  { %s1816_s20 = smov 128   ;;  %s1817_s21 = smov 8  }
   0xe   :  { %47 = dma.hbm_to_vmem [thread:$0]  %s2004_s3, 256, %s42_s18, [#allocation7], %s1816_s20, %s1816_s20, %s1817_s21  }
   0xf   :  { %s1818_s23 = smov [#allocation3]  }
  0x10   :  { %s29_s24 = sshll.u32 %s1818_s23, 4  ;;  %s30_s24 = int_to_ptr.vmem [resolvable:$true] %s29_s24 }
  0x11   :  { %s1735_s25 = scalar_lea.vmem %s30_s24, 4096  ;;  %p1740_p6 = scmp.lt.s32.totalorder %s30_s24, %s30_s24 }
  0x12   :  { %p1736_p5 = scmp.ne.s32.totalorder %s30_s24, %s1735_s25  ;;  %p1741_p7 = scmp.lt.s32.totalorder %s1735_s25, %s1735_s25 }
  0x14   :  { %p1742_p8 = por %p1741_p7, %p1740_p6 }
  0x16   :  { %p1743_p9 = pnand %p1742_p8, %p1736_p5 }
  0x18   :  { %1746 = shalt.err (!%p1743_p9)
}
  0x19   :  { %s1819_s26 = smov 64   ;;  %s1820_s27 = smov 4  }
  0x1a   :  { %35 = dma.hbm_to_vmem [thread:$0]  %s2003_s2, 4096, %s30_s24, [#allocation4], %s1819_s26, %s1819_s26, %s1820_s27  }
  0x1b   :  { %s1821_s30 = smov [#allocation8]   ;;  %s1822_s13 = smov [#allocation9]  }
  0x1c   :  { %s57_s12 = sshll.u32 %s1821_s30, 4  ;;  %s71_s3 = sshll.u32 %s1822_s13, 4  ;;  %s58_s12 = int_to_ptr.vmem [resolvable:$true] %s57_s12  ;;  %s72_s3 = int_to_ptr.vmem [resolvable:$true] %s71_s3 }
  0x1d   :  { %s1755_s14 = scalar_lea.vmem %s58_s12, 2048  ;;  %p1760_p11 = scmp.lt.s32.totalorder %s58_s12, %s58_s12 }
  0x1e   :  { %p1756_p10 = scmp.ne.s32.totalorder %s58_s12, %s1755_s14  ;;  %p1761_p12 = scmp.lt.s32.totalorder %s1755_s14, %s1755_s14 }
  0x20   :  { %p1762_p13 = por %p1761_p12, %p1760_p11 }
  0x22   :  { %p1763_p0 = pnand %p1762_p13, %p1756_p10 }
  0x24   :  { %1766 = shalt.err (!%p1763_p0)
}
  0x25   :  { %63 = dma.hbm_to_vmem [thread:$0]  %s2007_s6, 2048, %s58_s12, [#allocation7], %s1816_s20, %s1816_s20, %s1817_s21  }
  0x26   :  { %s1775_s2 = scalar_lea.vmem %s72_s3, 2048  ;;  %p1780_p2 = scmp.lt.s32.totalorder %s72_s3, %s72_s3 }
  0x27   :  { %p1776_p1 = scmp.ne.s32.totalorder %s72_s3, %s1775_s2  ;;  %p1781_p3 = scmp.lt.s32.totalorder %s1775_s2, %s1775_s2 }
  0x29   :  { %p1782_p4 = por %p1781_p3, %p1780_p2 }
  0x2b   :  { %p1783_p5 = pnand %p1782_p4, %p1776_p1 }
  0x2d   :  { %1786 = shalt.err (!%p1783_p5)
}
  0x2e   :  { %77 = dma.hbm_to_vmem [thread:$0]  %s2009_s8, 2048, %s72_s3, [#allocation10], %s1819_s26, %s1819_s26, %s1820_s27  }
  0x2f   :  { %1807 = dma.done.wait [#allocation4], 4096  }
  0x30   :  { %1808 = vsyncadd [#allocation4], 4294963200 }
  0x31   :  { %1809 = dma.done.wait [#allocation7], 2304  }
  0x32   :  { %1810 = vsyncadd [#allocation7], 4294964992 }
  0x33   :  { %1811 = dma.done.wait [#allocation10], 2048  }
  0x34   :  { %1812 = vsyncadd [#allocation10], 4294965248  ;;  %v1906_v0 = vld [vmem:[%s2001_s0] sm:$0xff]  ;;  %v1911_v1 = vld [vmem:[%s2001_s0 + $0x10] sm:$0xff]  ;;  %vm169_vm0 = vcmask 130048  }
  0x35   :  { %v1916_v2 = vld [vmem:[%s2001_s0 + $0x8] sm:$0xff]  ;;  %v99_v3 = vmul.f32 %v1906_v0, %v1906_v0  ;;  %v101_v4 = vmul.f32 %v1911_v1, %v1911_v1  ;;  %v1925_v5 = vld [vmem:[%s2001_s0 + $0x18] sm:$0xff]  ;;  %v1583_v8 = vld [vmem:[%s2002_s1] sm:$0xff]  }
  0x36   :  { %v100_v6 = vmul.f32 %v1916_v2, %v1916_v2  ;;  %v102_v7 = vmul.f32 %v1925_v5, %v1925_v5  ;;  %1555 = vmatprep.mubr.msk.bf16.mxu0 %vm169_vm0, %v1583_v8  ;;  %1565 = vmatprep.mubr.msk.bf16.mxu1 %vm169_vm0, %v1583_v8  ;;  %v1277_v26 = vld [vmem:[%s2005_s4] ss:$0 sm:$0xff]  ;;  %v1587_v35 = vld [vmem:[#allocation3 + $0x78] sm:$0xff]   ;;  %v1584_v38 = vld [vmem:[%s2002_s1 + $0x8] sm:$0xff]  }
  0x37   :  { %103 = vadd.xlane.f32.xlu0 %v99_v3  ;;  %107 = vadd.xlane.f32.xlu1 %v101_v4  ;;  %v1592_v37 = vld [vmem:[#allocation3 + $0xf8] sm:$0xff]   ;;  %v1585_v39 = vld [vmem:[%s2002_s1 + $0x10] sm:$0xff]   ;;  %v1591_v45 = vld [vmem:[#allocation3 + $0x68] sm:$0xff]  }
  0x38   :  { %v1588_v40 = vld [vmem:[#allocation3 + $0x38] sm:$0xff]   ;;  %v1589_v41 = vld [vmem:[#allocation3 + $0x70] sm:$0xff]   ;;  %v1600_v48 = vld [vmem:[#allocation3 + $0xe8] sm:$0xff]  }
  0x39   :  { %v1594_v42 = vld [vmem:[#allocation3 + $0xb8] sm:$0xff]   ;;  %v1596_v43 = vld [vmem:[#allocation3 + $0xf0] sm:$0xff]   ;;  %v1593_v49 = vld [vmem:[#allocation3 + $0x28] sm:$0xff]  }
  0x3a   :  { %v1590_v44 = vld [vmem:[#allocation3 + $0x30] sm:$0xff]   ;;  %v1586_v47 = vld [vmem:[%s2002_s1 + $0x18] sm:$0xff]   ;;  %v1595_v50 = vld [vmem:[#allocation3 + $0x60] sm:$0xff]  }
  0x3b   :  { %105 = vadd.xlane.f32.xlu0 %v100_v6  ;;  %109 = vadd.xlane.f32.xlu1 %v102_v7  ;;  %v1598_v46 = vld [vmem:[#allocation3 + $0xb0] sm:$0xff]   ;;  %v1602_v51 = vld [vmem:[#allocation3 + $0xa8] sm:$0xff]   ;;  %v1604_v52 = vld [vmem:[#allocation3 + $0xe0] sm:$0xff]  }
  0x3c   :  { %v1597_v53 = vld [vmem:[#allocation3 + $0x20] sm:$0xff]   ;;  %v1599_v54 = vld [vmem:[#allocation3 + $0x58] sm:$0xff]   ;;  %v1603_v57 = vld [vmem:[#allocation3 + $0x50] sm:$0xff]  }
  0x3d   :  { %v1606_v55 = vld [vmem:[#allocation3 + $0xa0] sm:$0xff]   ;;  %v1601_v56 = vld [vmem:[#allocation3 + $0x18] sm:$0xff]   ;;  %v1605_v58 = vld [vmem:[#allocation3 + $0x10] sm:$0xff]  }
  0x3e   :  { %v1607_v59 = vld [vmem:[#allocation3 + $0x48] sm:$0xff]   ;;  %v1608_v60 = vld [vmem:[#allocation3 + $0xd8] sm:$0xff]   ;;  %v1611_v63 = vld [vmem:[#allocation3 + $0x40] sm:$0xff]  }
  0x3f   :  { %v1609_v61 = vld [vmem:[#allocation3 + $0x8] sm:$0xff]   ;;  %v1610_v62 = vld [vmem:[#allocation3 + $0x98] sm:$0xff]   ;;  %v1612_v3 = vld [vmem:[#allocation3 + $0xd0] sm:$0xff]  }
  0x40   :  { %v1613_v4 = vld [vmem:[#allocation3] sm:$0xff]   ;;  %v1614_v6 = vld [vmem:[#allocation3 + $0x90] sm:$0xff]   ;;  %v1615_v7 = vld [vmem:[#allocation3 + $0xc8] sm:$0xff]  }
  0x41   :  { %v1616_v8 = vld [vmem:[#allocation3 + $0x88] sm:$0xff]  }
  0xc0   :  { %v104_v9 = vpop.xlane.xlu0 %103  ;;  %v108_v10 = vpop.xlane.xlu1 %107 }
  0xc1   :  { %v112_v11 = vmul.f32 0.0078125, %v104_v9  ;;  %v114_v12 = vmul.f32 0.0078125, %v108_v10  ;;  %v1617_v9 = vld [vmem:[#allocation3 + $0xc0] sm:$0xff]  }
  0xc2   :  { %v1618_v10 = vld [vmem:[#allocation3 + $0x80] sm:$0xff]  }
  0xc3   :  { %v116_v13 = vadd.f32 1.1920929e-07, %v112_v11  ;;  %v118_v14 = vadd.f32 1.1920929e-07, %v114_v12 }
  0xc4   :  { %v106_v15 = vpop.xlane.xlu0 %105  ;;  %v110_v16 = vpop.xlane.xlu1 %109 }
  0xc5   :  { %1659 = vrsqrt.f32 %v116_v13  ;;  %v113_v17 = vmul.f32 0.0078125, %v106_v15  ;;  %v115_v18 = vmul.f32 0.0078125, %v110_v16 }
  0xc6   :  { %1661 = vrsqrt.f32 %v118_v14 }
  0xc7   :  { %v117_v19 = vadd.f32 1.1920929e-07, %v113_v17  ;;  %v119_v20 = vadd.f32 1.1920929e-07, %v115_v18 }
  0xc9   :  { %1663 = vrsqrt.f32 %v117_v19 }
  0xca   :  { %1665 = vrsqrt.f32 %v119_v20 }
  0xd2   :  { %v1660_v21 = vpop.eup %1659 }
  0xd3   :  { %v1662_v22 = vpop.eup %1661  ;;  %v124_v24 = vmul.f32 %v1660_v21, %v1906_v0 }
  0xd4   :  { %v126_v23 = vmul.f32 %v1662_v22, %v1911_v1 }
  0xd5   :  { %v135_v31 = vmul.f32 %v1277_v26, %v124_v24 }
  0xd6   :  { %v1664_v25 = vpop.eup %1663  ;;  %v137_v30 = vmul.f32 %v1277_v26, %v126_v23 }
  0xd7   :  { %v1666_v27 = vpop.eup %1665  ;;  %v125_v28 = vmul.f32 %v1664_v25, %v1916_v2 }
  0xd8   :  { %v127_v29 = vmul.f32 %v1666_v27, %v1925_v5 }
  0xd9   :  { %v136_v32 = vmul.f32 %v1277_v26, %v125_v28 }
  0xda   :  { %v138_v33 = vmul.f32 %v1277_v26, %v127_v29 }
  0xdb   :  { %v139_v34 = vpack.c.bf16 %v136_v32, %v135_v31 }
  0xdc   :  { %v140_v36 = vpack.c.bf16 %v138_v33, %v137_v30 }
  0xdd   :  { %1553 = vmatprep.subr.bf16.mxu0 %v139_v34 }
  0xde   :  { %1554 = vmatpush3.bf16.msra.mxu0 %v139_v34  ;;  %1563 = vmatprep.subr.bf16.mxu1 %v140_v36 }
  0xdf   :  { %1564 = vmatpush3.bf16.msra.mxu1 %v140_v36  ;;  %1469 = vmatprep.subr.bf16.mxu0 %v1587_v35  ;;  %v1619_v35 = vld [vmem:[#allocation8 + $0x70] ss:$8 sps:$4 sm:$0xff]   ;;  %v1621_v36 = vld [vmem:[#allocation8 + $0x74] ss:$8 sps:$4 sm:$0xff]  }
  0xe0   :  { %1497 = vmatprep.subr.bf16.mxu1 %v1592_v37 }
  0xe1   :  { %1556 = vmatmul.mubr.msk.bf16.vlgmr.msra.gmra.mxu0 %vm169_vm0, %v1584_v38 }
  0xe2   :  { %1566 = vmatmul.mubr.msk.bf16.vlgmr.msra.gmra.mxu1 %vm169_vm0, %v1584_v38  ;;  %1559 = vmatprep.mubr.msk.bf16.mxu0 %vm169_vm0, %v1585_v39 }
  0xe3   :  { %1569 = vmatprep.mubr.msk.bf16.mxu1 %vm169_vm0, %v1585_v39  ;;  %1470 = vmatpush3.bf16.msra.mxu0 %v1588_v40 }
  0xe4   :  { %1471 = vmatprep.subr.bf16.mxu0 %v1589_v41  ;;  %1498 = vmatpush3.bf16.msra.mxu1 %v1594_v42 }
  0xe5   :  { %1499 = vmatprep.subr.bf16.mxu1 %v1596_v43 }
  0xe7   :  { %1472 = vmatpush3.bf16.msra.mxu0 %v1590_v44 }
  0xe8   :  { %1473 = vmatprep.subr.bf16.mxu0 %v1591_v45  ;;  %1500 = vmatpush3.bf16.msra.mxu1 %v1598_v46 }
  0xe9   :  { %1560 = vmatmul.mubr.msk.bf16.gmra.mxu0 %vm169_vm0, %v1586_v47  ;;  %1501 = vmatprep.subr.bf16.mxu1 %v1600_v48 }
  0xea   :  { %1570 = vmatmul.mubr.msk.bf16.gmra.mxu1 %vm169_vm0, %v1586_v47 }
  0xeb   :  { %1474 = vmatpush3.bf16.msra.mxu0 %v1593_v49 }
  0xec   :  { %1475 = vmatprep.subr.bf16.mxu0 %v1595_v50  ;;  %1502 = vmatpush3.bf16.msra.mxu1 %v1602_v51  ;;  %v794_v50 = vld [vmem:[#allocation6] sm:$0xff] }
  0xed   :  { %1503 = vmatprep.subr.bf16.mxu1 %v1604_v52 }
  0xef   :  { %1476 = vmatpush3.bf16.msra.mxu0 %v1597_v53 }
  0xf0   :  { %1477 = vmatprep.subr.bf16.mxu0 %v1599_v54  ;;  %1504 = vmatpush3.bf16.msra.mxu1 %v1606_v55 }
  0xf1   :  { %1505 = vmatprep.subr.bf16.mxu1 %v1608_v60 }
  0xf3   :  { %1478 = vmatpush3.bf16.msra.mxu0 %v1601_v56 }
  0xf4   :  { %1479 = vmatprep.subr.bf16.mxu0 %v1603_v57  ;;  %1506 = vmatpush3.bf16.msra.mxu1 %v1610_v62 }
  0xf5   :  { %1507 = vmatprep.subr.bf16.mxu1 %v1612_v3 }
  0xf7   :  { %1480 = vmatpush3.bf16.msra.mxu0 %v1605_v58 }
  0xf8   :  { %1481 = vmatprep.subr.bf16.mxu0 %v1607_v59  ;;  %1508 = vmatpush3.bf16.msra.mxu1 %v1614_v6  ;;  %v795_v59 = vld [vmem:[#allocation6 + $0x8] sm:$0xff] }
  0xf9   :  { %1509 = vmatprep.subr.bf16.mxu1 %v1615_v7 }
  0xfb   :  { %1482 = vmatpush3.bf16.msra.mxu0 %v1609_v61 }
  0xfc   :  { %1483 = vmatprep.subr.bf16.mxu0 %v1611_v63  ;;  %1510 = vmatpush3.bf16.msra.mxu1 %v1616_v8 }
  0xfd   :  { %1511 = vmatprep.subr.bf16.mxu1 %v1617_v9 }
  0xff   :  { %1484 = vmatpush3.bf16.msra.mxu0 %v1613_v4 }
 0x100   :  { %1512 = vmatpush3.bf16.msra.mxu1 %v1618_v10  ;;  %953 = vmatprep.subr.bf16.mxu0 %v1621_v36 }
 0x1a1   :  { %v1557_v11 = vpop.f32.mrf.mxu0 }
 0x1a2   :  { %v1567_v12 = vpop.f32.mrf.mxu1 }
 0x1a3   :  { %v216_v13 = vpop.f32.mrf.mxu0 }
 0x1a4   :  { %v321_v14 = vpop.f32.mrf.mxu1 }
 0x1a5   :  { %v1558_v15 = vpop.f32.mrf.mxu0 }
 0x1a6   :  { %v1452_v16 = vpack.c.bf16 %v1558_v15, %v1557_v11  ;;  %v1568_v17 = vpop.f32.mrf.mxu1 }
 0x1a7   :  { %v219_v18 = vpop.f32.mrf.mxu0  ;;  %v1456_v19 = vpack.c.bf16 %v1568_v17, %v1567_v12  ;;  %v1622_v17 = vld [vmem:[#allocation8 + $0x60] ss:$8 sps:$4 sm:$0xff]  }
 0x1a8   :  { %v1451_v20 = vpack.c.bf16 %v219_v18, %v216_v13  ;;  %728 = vmatprep.mubr.bf16.mxu0 %v1452_v16  ;;  %v324_v21 = vpop.f32.mrf.mxu1  ;;  %v1624_v16 = vld [vmem:[#allocation8 + $0x64] ss:$8 sps:$4 sm:$0xff]   ;;  %v1627_v18 = vld [vmem:[#allocation8 + $0x54] ss:$8 sps:$4 sm:$0xff]  }
 0x1a9   :  { %v1561_v22 = vpop.f32.mrf.mxu0  ;;  %v1455_v31 = vpack.c.bf16 %v324_v21, %v321_v14  ;;  %v1633_v21 = vld [vmem:[#allocation8 + $0x34] ss:$8 sps:$4 sm:$0xff]  }
 0x1aa   :  { %729 = vmatmul.mubr.bf16.vlgmr.msra.gmra.mxu0 %v1451_v20  ;;  %v1571_v23 = vpop.f32.mrf.mxu1  ;;  %v1630_v20 = vld [vmem:[#allocation8 + $0x44] ss:$8 sps:$4 sm:$0xff]  }
 0x1ab   :  { %v232_v24 = vpop.f32.mrf.mxu0  ;;  %736 = vmatprep.mubr.bf16.mxu0 %v1456_v19  ;;  %954 = vmatpush1.bf16.msra.mxu0 %v1619_v35  ;;  %v1625_v19 = vld [vmem:[#allocation8 + $0x50] ss:$8 sps:$4 sm:$0xff]  }
 0x1ac   :  { %v337_v25 = vpop.f32.mrf.mxu1  ;;  %955 = vmatprep.subr.bf16.mxu0 %v1624_v16 }
 0x1ad   :  { %v1562_v26 = vpop.f32.mrf.mxu0 }
 0x1ae   :  { %v1454_v27 = vpack.c.bf16 %v1562_v26, %v1561_v22  ;;  %v1572_v28 = vpop.f32.mrf.mxu1  ;;  %v1631_v22 = vld [vmem:[#allocation8 + $0x30] ss:$8 sps:$4 sm:$0xff]  }
 0x1af   :  { %v235_v29 = vpop.f32.mrf.mxu0  ;;  %v1458_v30 = vpack.c.bf16 %v1572_v28, %v1571_v23  ;;  %956 = vmatpush1.bf16.msra.mxu0 %v1622_v17  ;;  %v1636_v23 = vld [vmem:[#allocation8 + $0x24] ss:$8 sps:$4 sm:$0xff]   ;;  %v1637_v26 = vld [vmem:[#allocation8 + $0x10] ss:$8 sps:$4 sm:$0xff]  }
 0x1b0   :  { %v1453_v32 = vpack.c.bf16 %v235_v29, %v232_v24  ;;  %777 = vmatprep.mubr.bf16.mxu1 %v1454_v27  ;;  %v340_v33 = vpop.f32.mrf.mxu1  ;;  %957 = vmatprep.subr.bf16.mxu0 %v1627_v18  ;;  %v1634_v24 = vld [vmem:[#allocation8 + $0x20] ss:$8 sps:$4 sm:$0xff]   ;;  %v1642_v28 = vld [vmem:[#allocation8 + $0x4] ss:$8 sps:$4 sm:$0xff]   ;;  %v1823_v29 = vmov 0  }
 0x1b1   :  { %v1457_v34 = vpack.c.bf16 %v340_v33, %v337_v25  ;;  %v1639_v25 = vld [vmem:[#allocation8 + $0x14] ss:$8 sps:$4 sm:$0xff]   ;;  %v1640_v27 = vld [vmem:[#allocation8] ss:$8 sps:$4 sm:$0xff]  }
 0x1b2   :  { %737 = vmatmul.mubr.bf16.gmra.mxu0 %v1455_v31  ;;  %778 = vmatmul.mubr.bf16.vlgmr.msra.gmra.mxu1 %v1453_v32 }
 0x1b3   :  { %785 = vmatprep.mubr.bf16.mxu1 %v1458_v30  ;;  %958 = vmatpush1.bf16.msra.mxu0 %v1625_v19 }
 0x1b4   :  { %959 = vmatprep.subr.bf16.mxu0 %v1630_v20  ;;  %985 = vmatprep.mubr.bf16.mxu0 %v1823_v29 }
 0x1ba   :  { %786 = vmatmul.mubr.bf16.gmra.mxu1 %v1457_v34 }
 0x26a   :  { %v1485_v37 = vpop.f32.mrf.mxu0 }
 0x26c   :  { %v1486_v38 = vpop.f32.mrf.mxu0 }
 0x26d   :  { %v1487_v44 = vadd.f32 %v1486_v38, %v1485_v37 }
 0x26e   :  { %v1488_v39 = vpop.f32.mrf.mxu0 }
 0x270   :  { %v1489_v40 = vpop.f32.mrf.mxu0 }
 0x271   :  { %v1490_v51 = vadd.f32 %v1489_v40, %v1488_v39 }
 0x272   :  { %v1491_v41 = vpop.f32.mrf.mxu0  ;;  %v1513_v42 = vpop.f32.mrf.mxu1 }
 0x274   :  { %v1514_v43 = vpop.f32.mrf.mxu1  ;;  %v1492_v46 = vpop.f32.mrf.mxu0 }
 0x275   :  { %v1515_v45 = vadd.f32 %v1514_v43, %v1513_v42  ;;  %v1493_v60 = vadd.f32 %v1492_v46, %v1491_v41 }
 0x276   :  { %v1516_v47 = vpop.f32.mrf.mxu1  ;;  %v1494_v54 = vpop.f32.mrf.mxu0 }
 0x277   :  { %v780_v48 = vadd.f32 %v1515_v45, %v1487_v44  ;;  %v1346_v45 = vld [vmem:[%s2006_s5] ss:$0 sm:$0xff] }
 0x278   :  { %v1517_v49 = vpop.f32.mrf.mxu1  ;;  %v1495_v3 = vpop.f32.mrf.mxu0 }
 0x279   :  { %v796_v52 = vadd.f32 %v780_v48, %v1906_v0  ;;  %v1518_v53 = vadd.f32 %v1517_v49, %v1516_v47  ;;  %v1496_v8 = vadd.f32 %v1495_v3, %v1494_v54  ;;  %v1649_v3 = vld [vmem:[#allocation9 + $0x60] sm:$0xff]  }
 0x27a   :  { %v1519_v55 = vpop.f32.mrf.mxu1 }
 0x27b   :  { %v783_v56 = vadd.f32 %v1518_v53, %v1490_v51  ;;  %v1959_v57 = vadd.f32 %v796_v52, %v794_v50 }
 0x27c   :  { %v1520_v58 = vpop.f32.mrf.mxu1 }
 0x27d   :  { %v797_v61 = vadd.f32 %v783_v56, %v1916_v2  ;;  %v1521_v62 = vadd.f32 %v1520_v58, %v1519_v55  ;;  %v804_v63 = vmul.f32 %v1959_v57, %v1959_v57  ;;  %v1643_v58 = vld [vmem:[#allocation9 + $0x78] sm:$0xff]  }
 0x27e   :  { %v1522_v4 = vpop.f32.mrf.mxu1  ;;  %1525 = vmatprep.subr.bf16.mxu1 %v1643_v58 }
 0x27f   :  { %v788_v6 = vadd.f32 %v1521_v62, %v1493_v60  ;;  %808 = vadd.xlane.f32.xlu0 %v804_v63  ;;  %v1964_v0 = vadd.f32 %v797_v61, %v795_v59  ;;  %v1645_v60 = vld [vmem:[#allocation9 + $0x70] sm:$0xff]   ;;  %v1647_v62 = vld [vmem:[#allocation9 + $0x68] sm:$0xff]  }
 0x280   :  { %v1523_v7 = vpop.f32.mrf.mxu1  ;;  %v1646_v61 = vld [vmem:[#allocation9 + $0x30] sm:$0xff]   ;;  %v1648_v63 = vld [vmem:[#allocation9 + $0x28] sm:$0xff]  }
 0x281   :  { %v798_v9 = vadd.f32 %v788_v6, %v1911_v1  ;;  %v1524_v10 = vadd.f32 %v1523_v7, %v1522_v4  ;;  %v805_v11 = vmul.f32 %v1964_v0, %v1964_v0  ;;  %v1650_v4 = vld [vmem:[#allocation9 + $0x20] sm:$0xff]   ;;  %v1651_v6 = vld [vmem:[#allocation9 + $0x58] sm:$0xff]  }
 0x282   :  { %v1652_v7 = vld [vmem:[#allocation9 + $0x18] sm:$0xff]  }
 0x283   :  { %v791_v12 = vadd.f32 %v1524_v10, %v1496_v8  ;;  %810 = vadd.xlane.f32.xlu1 %v805_v11  ;;  %v1969_v2 = vadd.f32 %v798_v9, %v794_v50  ;;  %v1653_v8 = vld [vmem:[#allocation9 + $0x50] sm:$0xff]   ;;  %v1655_v10 = vld [vmem:[#allocation9 + $0x48] sm:$0xff]  }
 0x284   :  { %v1654_v9 = vld [vmem:[#allocation9 + $0x10] sm:$0xff]   ;;  %v1656_v11 = vld [vmem:[#allocation9 + $0x8] sm:$0xff]  }
 0x285   :  { %v799_v13 = vadd.f32 %v791_v12, %v1925_v5  ;;  %v806_v14 = vmul.f32 %v1969_v2, %v1969_v2  ;;  %v1628_v5 = vld [vmem:[#allocation8 + $0x40] ss:$8 sps:$4 sm:$0xff]  }
 0x286   :  { %960 = vmatpush1.bf16.msra.mxu0 %v1628_v5  ;;  %v1657_v12 = vld [vmem:[#allocation9 + $0x40] sm:$0xff]  }
 0x287   :  { %812 = vadd.xlane.f32.xlu0 %v806_v14  ;;  %v1974_v15 = vadd.f32 %v799_v13, %v795_v59  ;;  %961 = vmatprep.subr.bf16.mxu0 %v1633_v21  ;;  %v1644_v59 = vld [vmem:[#allocation9 + $0x38] sm:$0xff]   ;;  %v1658_v13 = vld [vmem:[#allocation9] sm:$0xff]   ;;  %v863_v14 = vlaneseq }
 0x288   :  { %1526 = vmatpush3.bf16.msra.mxu1 %v1644_v59 }
 0x289   :  { %v807_v1 = vmul.f32 %v1974_v15, %v1974_v15  ;;  %1527 = vmatprep.subr.bf16.mxu1 %v1645_v60  ;;  %v864_v16 = vshrl.u32 %v863_v14, 7 }
 0x28a   :  { %962 = vmatpush1.bf16.msra.mxu0 %v1631_v22 }
 0x28b   :  { %814 = vadd.xlane.f32.xlu1 %v807_v1  ;;  %963 = vmatprep.subr.bf16.mxu0 %v1636_v23  ;;  %v865_v17 = vsub.s32 0, %v864_v16  ;;  %v861_v1 = vld [vmem:[%s2008_s7] sm:$0x3]  ;;  %v869_v18 = vsub.s32 1, %v864_v16 }
 0x28c   :  { %1528 = vmatpush3.bf16.msra.mxu1 %v1646_v61 }
 0x28d   :  { %1529 = vmatprep.subr.bf16.mxu1 %v1647_v62  ;;  %v866_v19 = vrot.slane %v861_v1, %v865_v17  ;;  %v870_v20 = vrot.slane %v861_v1, %v869_v18 }
 0x28e   :  { %964 = vmatpush1.bf16.msra.mxu0 %v1634_v24 }
 0x28f   :  { %965 = vmatprep.subr.bf16.mxu0 %v1639_v25 }
 0x290   :  { %1530 = vmatpush3.bf16.msra.mxu1 %v1648_v63 }
 0x291   :  { %1531 = vmatprep.subr.bf16.mxu1 %v1649_v3 }
 0x292   :  { %966 = vmatpush1.bf16.msra.mxu0 %v1637_v26 }
 0x293   :  { %967 = vmatprep.subr.bf16.mxu0 %v1642_v28 }
 0x294   :  { %1532 = vmatpush3.bf16.msra.mxu1 %v1650_v4 }
 0x295   :  { %1533 = vmatprep.subr.bf16.mxu1 %v1651_v6 }
 0x296   :  { %968 = vmatpush1.bf16.msra.mxu0 %v1640_v27 }
 0x298   :  { %1534 = vmatpush3.bf16.msra.mxu1 %v1652_v7 }
 0x299   :  { %1535 = vmatprep.subr.bf16.mxu1 %v1653_v8 }
 0x29c   :  { %1536 = vmatpush3.bf16.msra.mxu1 %v1654_v9 }
 0x29d   :  { %1537 = vmatprep.subr.bf16.mxu1 %v1655_v10 }
 0x2a0   :  { %1538 = vmatpush3.bf16.msra.mxu1 %v1656_v11 }
 0x2a1   :  { %1539 = vmatprep.subr.bf16.mxu1 %v1657_v12 }
 0x2a4   :  { %1540 = vmatpush3.bf16.msra.mxu1 %v1658_v13 }
 0x308   :  { %v809_v30 = vpop.xlane.xlu0 %808 }
 0x309   :  { %v816_v31 = vmul.f32 0.0078125, %v809_v30 }
 0x30b   :  { %v820_v32 = vadd.f32 1.1920929e-07, %v816_v31 }
 0x30c   :  { %v811_v33 = vpop.xlane.xlu1 %810 }
 0x30d   :  { %1667 = vrsqrt.f32 %v820_v32  ;;  %v817_v34 = vmul.f32 0.0078125, %v811_v33 }
 0x30f   :  { %v821_v35 = vadd.f32 1.1920929e-07, %v817_v34 }
 0x310   :  { %v813_v36 = vpop.xlane.xlu0 %812 }
 0x311   :  { %1669 = vrsqrt.f32 %v821_v35  ;;  %v818_v37 = vmul.f32 0.0078125, %v813_v36 }
 0x313   :  { %v822_v38 = vadd.f32 1.1920929e-07, %v818_v37 }
 0x314   :  { %v815_v39 = vpop.xlane.xlu1 %814 }
 0x315   :  { %1671 = vrsqrt.f32 %v822_v38  ;;  %v819_v40 = vmul.f32 0.0078125, %v815_v39 }
 0x317   :  { %v823_v41 = vadd.f32 1.1920929e-07, %v819_v40 }
 0x319   :  { %1673 = vrsqrt.f32 %v823_v41 }
 0x31a   :  { %v1668_v42 = vpop.eup %1667 }
 0x31b   :  { %v828_v43 = vmul.f32 %v1668_v42, %v1959_v57 }
 0x31d   :  { %v839_v47 = vmul.f32 %v1346_v45, %v828_v43 }
 0x31e   :  { %v1670_v44 = vpop.eup %1669 }
 0x31f   :  { %v829_v46 = vmul.f32 %v1670_v44, %v1964_v0 }
 0x321   :  { %v840_v48 = vmul.f32 %v1346_v45, %v829_v46 }
 0x322   :  { %v1672_v49 = vpop.eup %1671 }
 0x323   :  { %v843_v50 = vpack.c.bf16 %v840_v48, %v839_v47  ;;  %v830_v51 = vmul.f32 %v1672_v49, %v1969_v2 }
 0x325   :  { %986 = vmatmul.mubr.bf16.vlgmr.msra.gmra.mxu0 %v843_v50  ;;  %v841_v54 = vmul.f32 %v1346_v45, %v830_v51 }
 0x326   :  { %v1674_v52 = vpop.eup %1673  ;;  %995 = vmatprep.mubr.bf16.mxu0 %v1823_v29 }
 0x327   :  { %v831_v53 = vmul.f32 %v1674_v52, %v1974_v15 }
 0x329   :  { %v842_v55 = vmul.f32 %v1346_v45, %v831_v53 }
 0x32b   :  { %v844_v56 = vpack.c.bf16 %v842_v55, %v841_v54 }
 0x32d   :  { %996 = vmatmul.mubr.bf16.gmra.mxu0 %v844_v56 }
 0x3e5   :  { %v987_v5 = vpop.f32.mrf.mxu0 }
 0x3e6   :  { %v988_v21 = vadd.f32 %v987_v5, %v866_v19 }
 0x3e7   :  { %v989_v22 = vpop.f32.mrf.mxu0 }
 0x3e8   :  { %v1363_v23 = vmul.f32 -1.442695, %v988_v21  ;;  %v990_v24 = vadd.f32 %v989_v22, %v870_v20 }
 0x3e9   :  { %v991_v25 = vpop.f32.mrf.mxu0 }
 0x3ea   :  { %v1364_v26 = vmul.f32 -1.442695, %v990_v24  ;;  %v992_v27 = vadd.f32 %v991_v25, %v866_v19  ;;  %1675 = vpow2.f32 %v1363_v23 }
 0x3eb   :  { %v993_v28 = vpop.f32.mrf.mxu0 }
 0x3ec   :  { %1677 = vpow2.f32 %v1364_v26  ;;  %v1365_v29 = vmul.f32 -1.442695, %v992_v27  ;;  %v994_v30 = vadd.f32 %v993_v28, %v870_v20 }
 0x3ed   :  { %v997_v31 = vpop.f32.mrf.mxu0 }
 0x3ee   :  { %1679 = vpow2.f32 %v1365_v29  ;;  %v1366_v32 = vmul.f32 -1.442695, %v994_v30  ;;  %v998_v33 = vadd.f32 %v997_v31, %v866_v19 }
 0x3ef   :  { %v999_v34 = vpop.f32.mrf.mxu0 }
 0x3f0   :  { %1681 = vpow2.f32 %v1366_v32  ;;  %v1367_v35 = vmul.f32 -1.442695, %v998_v33  ;;  %v1000_v36 = vadd.f32 %v999_v34, %v870_v20 }
 0x3f1   :  { %v1001_v37 = vpop.f32.mrf.mxu0 }
 0x3f2   :  { %v1368_v38 = vmul.f32 -1.442695, %v1000_v36  ;;  %v1002_v39 = vadd.f32 %v1001_v37, %v866_v19  ;;  %1683 = vpow2.f32 %v1367_v35 }
 0x3f3   :  { %v1003_v40 = vpop.f32.mrf.mxu0 }
 0x3f4   :  { %1685 = vpow2.f32 %v1368_v38  ;;  %v1369_v41 = vmul.f32 -1.442695, %v1002_v39  ;;  %v1004_v42 = vadd.f32 %v1003_v40, %v870_v20 }
 0x3f6   :  { %1687 = vpow2.f32 %v1369_v41  ;;  %v1370_v43 = vmul.f32 -1.442695, %v1004_v42 }
 0x3f7   :  { %v1676_v44 = vpop.eup %1675 }
 0x3f8   :  { %1689 = vpow2.f32 %v1370_v43  ;;  %v1030_v48 = vadd.f32 1.0, %v1676_v44 }
 0x3f9   :  { %v1678_v45 = vpop.eup %1677 }
 0x3fa   :  { %v1031_v46 = vadd.f32 1.0, %v1678_v45 }
 0x3fb   :  { %v1680_v47 = vpop.eup %1679 }
 0x3fc   :  { %v1032_v49 = vadd.f32 1.0, %v1680_v47  ;;  %1691 = vrcp.f32 %v1031_v46 }
 0x3fd   :  { %v1682_v50 = vpop.eup %1681 }
 0x3fe   :  { %1693 = vrcp.f32 %v1032_v49  ;;  %v1033_v51 = vadd.f32 1.0, %v1682_v50 }
 0x3ff   :  { %1695 = vrcp.f32 %v1030_v48  ;;  %v1684_v52 = vpop.eup %1683 }
 0x400   :  { %1697 = vrcp.f32 %v1033_v51  ;;  %v1034_v56 = vadd.f32 1.0, %v1684_v52 }
 0x401   :  { %v1686_v53 = vpop.eup %1685 }
 0x402   :  { %v1035_v54 = vadd.f32 1.0, %v1686_v53 }
 0x403   :  { %v1688_v55 = vpop.eup %1687 }
 0x404   :  { %v1036_v58 = vadd.f32 1.0, %v1688_v55  ;;  %1699 = vrcp.f32 %v1035_v54 }
 0x405   :  { %v1690_v59 = vpop.eup %1689 }
 0x406   :  { %1701 = vrcp.f32 %v1036_v58  ;;  %v1037_v60 = vadd.f32 1.0, %v1690_v59 }
 0x407   :  { %1703 = vrcp.f32 %v1034_v56 }
 0x408   :  { %1705 = vrcp.f32 %v1037_v60 }
 0x409   :  { %v1692_v61 = vpop.eup %1691 }
 0x40a   :  { %v1055_v6 = vmul.f32 %v1692_v61, %v990_v24 }
 0x40b   :  { %v1694_v62 = vpop.eup %1693 }
 0x40c   :  { %v1696_v63 = vpop.eup %1695  ;;  %v1056_v4 = vmul.f32 %v1694_v62, %v992_v27 }
 0x40d   :  { %v1698_v3 = vpop.eup %1697  ;;  %v1054_v8 = vmul.f32 %v1696_v63, %v988_v21  ;;  %v1371_v21 = vld [vmem:[%s2010_s9] ss:$0 sm:$0xff]  ;;  %s1824_s9 = smov [#allocation11]  }
 0x40e   :  { %v1057_v7 = vmul.f32 %v1698_v3, %v994_v30  ;;  %s1263_s2 = sshll.u32 %s1824_s9, 4  ;;  %s1264_s2 = int_to_ptr.vmem [resolvable:$true] %s1263_s2 }
 0x40f   :  { %v1062_v10 = vpack.c.bf16 %v1056_v4, %v1054_v8  ;;  %s1787_s17 = scalar_lea.vmem %s1264_s2, 512  ;;  %p1792_p7 = scmp.lt.s32.totalorder %s1264_s2, %s1264_s2 }
 0x410   :  { %v1063_v9 = vpack.c.bf16 %v1057_v7, %v1055_v6  ;;  %p1788_p6 = scmp.ne.s32.totalorder %s1264_s2, %s1787_s17  ;;  %p1793_p8 = scmp.lt.s32.totalorder %s1787_s17, %s1787_s17 }
 0x411   :  { %v1700_v11 = vpop.eup %1699 }
 0x412   :  { %1233 = vmatprep.mubr.bf16.mxu1 %v1063_v9  ;;  %v1059_v17 = vmul.f32 %v1700_v11, %v1000_v36  ;;  %p1794_p9 = por %p1793_p8, %p1792_p7 }
 0x413   :  { %v1702_v12 = vpop.eup %1701  ;;  %1234 = vmatmul.mubr.bf16.vlgmr.msra.gmra.mxu1 %v1062_v10 }
 0x414   :  { %v1704_v13 = vpop.eup %1703  ;;  %v1060_v16 = vmul.f32 %v1702_v12, %v1002_v39  ;;  %p1795_p10 = pnand %p1794_p9, %p1788_p6 }
 0x415   :  { %v1706_v14 = vpop.eup %1705  ;;  %v1058_v18 = vmul.f32 %v1704_v13, %v998_v33 }
 0x416   :  { %v1061_v1 = vmul.f32 %v1706_v14, %v1004_v42 }
 0x417   :  { %v1064_v20 = vpack.c.bf16 %v1060_v16, %v1058_v18 }
 0x418   :  { %v1065_v19 = vpack.c.bf16 %v1061_v1, %v1059_v17 }
 0x41a   :  { %1241 = vmatprep.mubr.bf16.mxu1 %v1065_v19 }
 0x41b   :  { %1242 = vmatmul.mubr.bf16.gmra.mxu1 %v1064_v20 }
 0x4d3   :  { %v1541_v5 = vpop.f32.mrf.mxu1 }
 0x4d5   :  { %v1542_v22 = vpop.f32.mrf.mxu1 }
 0x4d6   :  { %v1543_v23 = vadd.f32 %v1542_v22, %v1541_v5 }
 0x4d7   :  { %v1544_v24 = vpop.f32.mrf.mxu1 }
 0x4d8   :  { %v1236_v25 = vadd.f32 %v1543_v23, %v1371_v21 }
 0x4d9   :  { %v1545_v26 = vpop.f32.mrf.mxu1 }
 0x4da   :  { %v1250_v27 = vadd.f32 %v1236_v25, %v1959_v57  ;;  %v1546_v28 = vadd.f32 %v1545_v26, %v1544_v24 }
 0x4db   :  { %v1547_v29 = vpop.f32.mrf.mxu1 }
 0x4dc   :  { %1254 = vst [vmem:[#allocation11] sm:$0xff] %v1250_v27  ;;  %v1239_v30 = vadd.f32 %v1546_v28, %v1371_v21 }
 0x4dd   :  { %v1548_v31 = vpop.f32.mrf.mxu1 }
 0x4de   :  { %v1251_v32 = vadd.f32 %v1239_v30, %v1964_v0  ;;  %v1549_v33 = vadd.f32 %v1548_v31, %v1547_v29 }
 0x4df   :  { %v1550_v34 = vpop.f32.mrf.mxu1 }
 0x4e0   :  { %1255 = vst [vmem:[#allocation11 + $0x8] sm:$0xff] %v1251_v32  ;;  %v1244_v35 = vadd.f32 %v1549_v33, %v1371_v21 }
 0x4e1   :  { %v1551_v36 = vpop.f32.mrf.mxu1 }
 0x4e2   :  { %v1252_v37 = vadd.f32 %v1244_v35, %v1969_v2  ;;  %v1552_v38 = vadd.f32 %v1551_v36, %v1550_v34 }
 0x4e4   :  { %1256 = vst [vmem:[#allocation11 + $0x10] sm:$0xff] %v1252_v37  ;;  %v1247_v39 = vadd.f32 %v1552_v38, %v1371_v21 }
 0x4e6   :  { %v1253_v57 = vadd.f32 %v1247_v39, %v1974_v15 }
 0x4e8   :  { %1257 = vst [vmem:[#allocation11 + $0x18] sm:$0xff] %v1253_v57 }
 0x4e9   :  { %1798 = shalt.err (!%p1795_p10)
}
 0x4ea   :  { %1269 = dma.vmem_to_hbm [thread:$0]  %s1264_s2, 512, %s2012_s11, [#allocation5], %s1816_s20, %s1816_s20, %s1817_s21  }
 0x4eb   :  { %1813 = dma.done.wait [#allocation5], 512  }
 0x4ec   :  { %1814 = vsyncadd [#allocation5], 4294966784 }
 0x4ed   :  { %1273 = vsyncpa [#allocation4], 1 }
 0x4ee   :  { %1274 = vsyncpa [#allocation7], 1 }
 0x4ef   :  { %1275 = vsyncpa [#allocation10], 1 }
 0x4f0   :  { %1276 = vsyncpa [#allocation5], 1 }

</bundles_post_ra>
